<compile_context>
chip_gen: v7x
topology: tpu7x:2x2x1
jax: 0.10.0
libtpu: 0.0.40
codegen_flags: <defaults>
</compile_context>

<pallas_src>
import jax
import jax.numpy as jnp
import numpy as np
from jax.experimental import pallas as pl
from jax.experimental.pallas import tpu as pltpu

NUM_TREES = 2
DEPTH = 2
NUM_LEAVES = 2 ** DEPTH            # 4
NUM_DECISION = NUM_LEAVES - 1      # 3
NUM_TERMS = 4                      # (t0,n1) (t0,n2) (t1,n1) (t1,n2)

_UNSET = object()
_INV_PIPELINE_MODE = _UNSET        # cached result of the Buffered(1) probe


def _round_up(x, m):
    return (x + m - 1) // m * m


# --------------------------------------------------------------------------
# Offline parameter packing (hoisted out of the per-forward path).
# --------------------------------------------------------------------------
def pack_params(params, *, dtype=jnp.float32):
    """Fold the combiner into the leaf linears and split into base/delta/dec.

    Returns a dict of arrays; call once per parameter update, NOT per forward.
    `dtype` controls the matmul-operand dtype (jnp.bfloat16 halves weight
    VMEM/HBM bytes and MXU passes; accumulation stays f32 in the kernel).
    """
    dec_w, dec_b, leaf_w, leaf_b, comb_w, comb_b = params
    d = comb_w.shape[1]
    hi = jax.lax.Precision.HIGHEST

    # Wfold[t,l] = leaf_w[t,l] @ comb_w[t]  (and biases through the combiner).
    wl, bl = [], []
    for t in range(NUM_TREES):
        cw = comb_w[t * d:(t + 1) * d, :]                         # (D, D)
        for l in range(NUM_LEAVES):
            wl.append(jnp.dot(leaf_w[t][:, l * d:(l + 1) * d], cw, precision=hi))
            bl.append(jnp.dot(leaf_b[t][:, l * d:(l + 1) * d], cw, precision=hi))

    # Leaf probs per tree are [d1, 1-d1, d2, 1-d2] (PyTorch code semantics:
    # node 0 never propagates to the leaf slots), so per tree:
    #   tree_t = (L1 + L3) + d1*(L0 - L1) + d2*(L2 - L3)
    w_base = wl[1] + wl[3] + wl[5] + wl[7]
    b_base = bl[1] + bl[3] + bl[5] + bl[7] + comb_b
    w_delta = jnp.stack([wl[0] - wl[1], wl[2] - wl[3],
                         wl[4] - wl[5], wl[6] - wl[7]])            # (4, D, D)
    b_delta = jnp.stack([bl[0] - bl[1], bl[2] - bl[3],
                         bl[4] - bl[5], bl[6] - bl[7]])            # (4, 1, D)

    # Only decision nodes 1 and 2 of each tree reach the leaves.
    w_dec = jnp.stack([dec_w[0][:, 1], dec_w[0][:, 2],
                       dec_w[1][:, 1], dec_w[1][:, 2]], axis=1)    # (D, 4)
    b_dec = jnp.stack([dec_b[0][0, 1], dec_b[0][0, 2],
                       dec_b[1][0, 1], dec_b[1][0, 2]])[None, :]   # (1, 4)

    return dict(
        w_dec=w_dec.astype(dtype), b_dec=b_dec.astype(jnp.float32),
        w_base=w_base.astype(dtype), b_base=b_base.astype(jnp.float32),
        w_delta=w_delta.astype(dtype), b_delta=b_delta.astype(jnp.float32),
    )


# --------------------------------------------------------------------------
# Kernel: one token tile = 6 exact-width MXU dots + tiny VPU/EUP epilogue.
# --------------------------------------------------------------------------
def _pdt_kernel(x_ref, w_dec_ref, b_dec_ref, w_base_ref, b_base_ref,
                w_delta_ref, b_delta_ref, o_ref):
    x = x_ref[...].astype(w_base_ref.dtype)                        # (tile, D)
    # Decision logits of the 4 used nodes (tiny dot; output lanes = 4).
    dec = jax.nn.sigmoid(
        jnp.dot(x, w_dec_ref[...], preferred_element_type=jnp.float32)
        + b_dec_ref[...])                                          # (tile, 4)
    # Base term (combiner bias folded in).
    acc = (jnp.dot(x, w_base_ref[...], preferred_element_type=jnp.float32)
           + b_base_ref[...])                                      # (tile, D)
    for i in range(NUM_TERMS):                                     # static unroll
        delta = (jnp.dot(x, w_delta_ref[i], preferred_element_type=jnp.float32)
                 + b_delta_ref[i])
        acc = acc + dec[:, i:i + 1] * delta
    o_ref[...] = acc.astype(o_ref.dtype)


# --------------------------------------------------------------------------
# Hardware-adaptive knobs.
# --------------------------------------------------------------------------
def _vmem_limit_bytes():
    try:
        cap = int(pltpu.get_tpu_info().vmem_capacity_bytes)
    except Exception:
        cap = 64 * 1024 * 1024          # assume the smallest (v7x) if unknown
    # ~75% of physical, capped at 100 MiB: 96 MiB on v5e/v6e, 48 MiB on v7x.
    return min((cap * 3) // 4, 100 * 1024 * 1024)


def _choose_tile_n(n_tokens, d, w_bytes, vmem_limit, desired=1024):
    """Largest token tile that fits the VMEM budget alongside the weights, while
    keeping >=2 grid steps so the 'parallel' token axis spans both TensorCores
    on megacore parts (v7x)."""
    per_row = (2 + 2) * d * 4 + 6 * d * 4   # x/out double-buffers + f32 temps
    budget = vmem_limit - w_bytes - (2 << 20)
    t = desired
    if budget > 0:
        t = min(t, max(budget // per_row, 8))
    else:
        # TODO(synk): for very large D on v7x, stream the weight segments over a
        # second ("arbitrary") grid axis instead of keeping them all resident.
        t = 8
    if n_tokens >= 16:
        t = min(t, _round_up(pl.cdiv(n_tokens, 2), 8))
    t = min(t, _round_up(n_tokens, 8))
    return max(8, (t // 8) * 8)


def _invariant_pipeline_mode():
    """pl.Buffered(1) if single-buffering of grid-invariant operands compiles on
    this Pallas version, else None (default double-buffering). Probed once."""
    global _INV_PIPELINE_MODE
    if _INV_PIPELINE_MODE is not _UNSET:
        return _INV_PIPELINE_MODE
    try:
        mode = pl.Buffered(1)

        def k(a_ref, w_ref, o_ref):
            o_ref[...] = a_ref[...] + w_ref[...]

        f = pl.pallas_call(
            k,
            out_shape=jax.ShapeDtypeStruct((8, 128), jnp.float32),
            grid=(1,),
            in_specs=[pl.BlockSpec((8, 128), lambda i: (0, 0)),
                      pl.BlockSpec((8, 128), lambda i: (0, 0),
                                   pipeline_mode=mode)],
            out_specs=pl.BlockSpec((8, 128), lambda i: (0, 0)),
        )
        z = jnp.zeros((8, 128), jnp.float32)
        jax.jit(f).lower(z, z).compile()
        _INV_PIPELINE_MODE = mode
    except Exception:
        _INV_PIPELINE_MODE = None
    return _INV_PIPELINE_MODE


# --------------------------------------------------------------------------
# Forward wrapper.
# --------------------------------------------------------------------------
def parallel_decision_trees(x, packed, *, tile_n=None):
    """x: (B, S, D) -> (B, S, D).  `packed` = pack_params(params) (hoisted)."""
    B, S, D = x.shape
    N = B * S
    xf = x.reshape(N, D)                       # collapse-leading reshape: free

    w_dec, b_dec = packed["w_dec"], packed["b_dec"]
    w_base, b_base = packed["w_base"], packed["b_base"]
    w_delta, b_delta = packed["w_delta"], packed["b_delta"]

    w_bytes = sum(int(a.size) * a.dtype.itemsize
                  for a in (w_dec, b_dec, w_base, b_base, w_delta, b_delta))
    vmem_limit = _vmem_limit_bytes()
    if tile_n is None:
        tile_n = _choose_tile_n(N, D, w_bytes, vmem_limit)
    grid = (pl.cdiv(N, tile_n),)               # partial last block masked by Pallas

    inv_mode = _invariant_pipeline_mode()
    inv_kw = {} if inv_mode is None else {"pipeline_mode": inv_mode}

    cost = pl.CostEstimate(
        flops=2 * N * D * (5 * D + NUM_TERMS) + 12 * N * D,
        transcendentals=NUM_TERMS * N,
        bytes_accessed=2 * N * D * x.dtype.itemsize + w_bytes,
    )

    # TODO(synk): if production D < 128, consider repacking k=128//D tokens per
    # row in HBM for fully lane-dense (unmasked) stores.
    out = pl.pallas_call(
        _pdt_kernel,
        out_shape=jax.ShapeDtypeStruct((N, D), x.dtype),
        grid=grid,
        in_specs=[
            pl.BlockSpec((tile_n, D), lambda i: (i, 0)),                      # x tile
            pl.BlockSpec((D, NUM_TERMS), lambda i: (0, 0), **inv_kw),         # dec W
            pl.BlockSpec((1, NUM_TERMS), lambda i: (0, 0), **inv_kw),         # dec b
            pl.BlockSpec((D, D), lambda i: (0, 0), **inv_kw),                 # base W
            pl.BlockSpec((1, D), lambda i: (0, 0), **inv_kw),                 # base b
            pl.BlockSpec((NUM_TERMS, D, D), lambda i: (0, 0, 0), **inv_kw),   # delta W
            pl.BlockSpec((NUM_TERMS, 1, D), lambda i: (0, 0, 0), **inv_kw),   # delta b
        ],
        out_specs=pl.BlockSpec((tile_n, D), lambda i: (i, 0)),
        compiler_params=pltpu.CompilerParams(
            dimension_semantics=("parallel",),
            vmem_limit_bytes=int(vmem_limit),
        ),
        cost_estimate=cost,
    )(xf, w_dec, b_dec, w_base, b_base, w_delta, b_delta)
    return out.reshape(B, S, D)


# --------------------------------------------------------------------------
# Synthetic parameters + pure-JAX reference (mirrors the PyTorch forward).
# --------------------------------------------------------------------------
def init_params(key, n_embd):
    """Parameters in (in, out) layout so y = x @ W + b."""
    D = n_embd
    ks = jax.random.split(key, 6)
    scale = 0.05
    dec_w = scale * jax.random.normal(ks[0], (NUM_TREES, D, NUM_DECISION), jnp.float32)
    dec_b = scale * jax.random.normal(ks[1], (NUM_TREES, 1, NUM_DECISION), jnp.float32)
    leaf_w = scale * jax.random.normal(ks[2], (NUM_TREES, D, NUM_LEAVES * D), jnp.float32)
    leaf_b = scale * jax.random.normal(ks[3], (NUM_TREES, 1, NUM_LEAVES * D), jnp.float32)
    comb_w = scale * jax.random.normal(ks[4], (NUM_TREES * D, D), jnp.float32)
    comb_b = scale * jax.random.normal(ks[5], (1, D), jnp.float32)
    return dec_w, dec_b, leaf_w, leaf_b, comb_w, comb_b


def reference(x, params):
    """Pure-JAX mirror of the PyTorch forward.  Matching the PyTorch code, the
    leaf probabilities are [d1, 1-d1, d2, 1-d2]: node 0 only multiplies the
    internal slots of all_probs, which are discarded when slicing the leaves."""
    dec_w, dec_b, leaf_w, leaf_b, comb_w, comb_b = params
    B, S, D = x.shape
    tree_outs = []
    for t in range(NUM_TREES):
        dec = jax.nn.sigmoid(x @ dec_w[t] + dec_b[t])              # (B,S,3)
        leaf = (x @ leaf_w[t] + leaf_b[t]).reshape(B, S, NUM_LEAVES, D)
        d1, d2 = dec[..., 1], dec[..., 2]
        probs = jnp.stack([d1, 1 - d1, d2, 1 - d2], axis=-1)       # (B,S,4)
        tree_outs.append(jnp.sum(leaf * probs[..., None], axis=2))
    combined = jnp.concatenate(tree_outs, axis=-1)
    return combined @ comb_w + comb_b


if __name__ == "__main__":
    key = jax.random.PRNGKey(0)
    kx, kp = jax.random.split(key)

    B, S, D = 2, 8, 32   # batch=2, seq=8, n_embd=32
    x = jax.random.normal(kx, (B, S, D), jnp.float32)
    params = init_params(kp, D)

    packed = pack_params(params)   # hoisted: once per parameter update, not per forward
    out = parallel_decision_trees(x, packed)
    out = jax.block_until_ready(out)

    ref = reference(x, params)
    np.testing.assert_allclose(np.asarray(out), np.asarray(ref),
                               rtol=1e-5, atol=1e-5)
    print("KERNEL_OK")
</pallas_src>

<mosaic_0001>
module attributes {stable_mosaic.version = 11 : i64} {
  func.func @_pdt_kernel(%arg0: i32, %arg1: memref<8x32xf32, #tpu.memory_space<vmem>>, %arg2: memref<32x4xf32, #tpu.memory_space<vmem>>, %arg3: memref<1x4xf32, #tpu.memory_space<vmem>>, %arg4: memref<32x32xf32, #tpu.memory_space<vmem>>, %arg5: memref<1x32xf32, #tpu.memory_space<vmem>>, %arg6: memref<4x32x32xf32, #tpu.memory_space<vmem>>, %arg7: memref<4x1x32xf32, #tpu.memory_space<vmem>>, %arg8: memref<8x32xf32, #tpu.memory_space<vmem>>) attributes {dimension_semantics = [#tpu.dimension_semantics<parallel>], iteration_bounds = array<i64: 2>, scalar_prefetch = 0 : i64, scratch_operands = 0 : i64, tpu.core_type = #tpu.core_type<tc>, window_params = [{transform_indices = @transform_0, window_bounds = array<i64: 8, 32>}, {pipeline_mode = #tpu.pipeline_mode<synchronous>, transform_indices = @transform_1, window_bounds = array<i64: 32, 4>}, {pipeline_mode = #tpu.pipeline_mode<synchronous>, transform_indices = @transform_2, window_bounds = array<i64: 1, 4>}, {pipeline_mode = #tpu.pipeline_mode<synchronous>, transform_indices = @transform_3, window_bounds = array<i64: 32, 32>}, {pipeline_mode = #tpu.pipeline_mode<synchronous>, transform_indices = @transform_4, window_bounds = array<i64: 1, 32>}, {pipeline_mode = #tpu.pipeline_mode<synchronous>, transform_indices = @transform_5, window_bounds = array<i64: 4, 32, 32>}, {pipeline_mode = #tpu.pipeline_mode<synchronous>, transform_indices = @transform_6, window_bounds = array<i64: 4, 1, 32>}, {transform_indices = @transform_7, window_bounds = array<i64: 8, 32>}]} {
    %c0 = arith.constant 0 : index
    %c0_0 = arith.constant 0 : index
    %0 = vector.load %arg1[%c0, %c0_0] : memref<8x32xf32, #tpu.memory_space<vmem>>, vector<8x32xf32>
    %c0_1 = arith.constant 0 : index
    %c0_2 = arith.constant 0 : index
    %1 = vector.load %arg2[%c0_1, %c0_2] : memref<32x4xf32, #tpu.memory_space<vmem>>, vector<32x4xf32>
    %cst = arith.constant dense<0.000000e+00> : vector<8x4xf32>
    %2 = tpu.matmul %0, %1, %cst {dimension_numbers = #tpu.dot_dimension_numbers<[1], [0], [0], [1], [0, 0, 1, 1], [], []>} : vector<8x32xf32>, vector<32x4xf32>, vector<8x4xf32> -> vector<8x4xf32>
    %c0_3 = arith.constant 0 : index
    %c0_4 = arith.constant 0 : index
    %3 = vector.load %arg3[%c0_3, %c0_4] : memref<1x4xf32, #tpu.memory_space<vmem>>, vector<1x4xf32>
    %4 = vector.broadcast %3 : vector<1x4xf32> to vector<8x4xf32>
    %5 = arith.addf %2, %4 : vector<8x4xf32>
    %6 = arith.negf %5 : vector<8x4xf32>
    %7 = math.exp %6 : vector<8x4xf32>
    %cst_5 = arith.constant 1.000000e+00 : f32
    %8 = vector.broadcast %cst_5 : f32 to vector<8x4xf32>
    %9 = arith.addf %8, %7 : vector<8x4xf32>
    %10 = arith.divf %8, %9 : vector<8x4xf32>
    %c0_6 = arith.constant 0 : index
    %c0_7 = arith.constant 0 : index
    %11 = vector.load %arg4[%c0_6, %c0_7] : memref<32x32xf32, #tpu.memory_space<vmem>>, vector<32x32xf32>
    %cst_8 = arith.constant dense<0.000000e+00> : vector<8x32xf32>
    %12 = tpu.matmul %0, %11, %cst_8 {dimension_numbers = #tpu.dot_dimension_numbers<[1], [0], [0], [1], [0, 0, 1, 1], [], []>} : vector<8x32xf32>, vector<32x32xf32>, vector<8x32xf32> -> vector<8x32xf32>
    %c0_9 = arith.constant 0 : index
    %c0_10 = arith.constant 0 : index
    %13 = vector.load %arg5[%c0_9, %c0_10] : memref<1x32xf32, #tpu.memory_space<vmem>>, vector<1x32xf32>
    %14 = vector.broadcast %13 : vector<1x32xf32> to vector<8x32xf32>
    %15 = arith.addf %12, %14 : vector<8x32xf32>
    %c0_11 = arith.constant 0 : index
    %c0_12 = arith.constant 0 : index
    %c0_13 = arith.constant 0 : index
    %16 = vector.load %arg6[%c0_11, %c0_12, %c0_13] : memref<4x32x32xf32, #tpu.memory_space<vmem>>, vector<1x32x32xf32>
    %17 = vector.shape_cast %16 : vector<1x32x32xf32> to vector<32x32xf32>
    %cst_14 = arith.constant dense<0.000000e+00> : vector<8x32xf32>
    %18 = tpu.matmul %0, %17, %cst_14 {dimension_numbers = #tpu.dot_dimension_numbers<[1], [0], [0], [1], [0, 0, 1, 1], [], []>} : vector<8x32xf32>, vector<32x32xf32>, vector<8x32xf32> -> vector<8x32xf32>
    %c0_15 = arith.constant 0 : index
    %c0_16 = arith.constant 0 : index
    %c0_17 = arith.constant 0 : index
    %19 = vector.load %arg7[%c0_15, %c0_16, %c0_17] : memref<4x1x32xf32, #tpu.memory_space<vmem>>, vector<1x1x32xf32>
    %20 = vector.shape_cast %19 : vector<1x1x32xf32> to vector<1x32xf32>
    %21 = vector.broadcast %20 : vector<1x32xf32> to vector<8x32xf32>
    %22 = arith.addf %18, %21 : vector<8x32xf32>
    %23 = vector.extract_strided_slice %10 {offsets = [0, 0], sizes = [8, 1], strides = [1, 1]} : vector<8x4xf32> to vector<8x1xf32>
    %24 = vector.broadcast %23 : vector<8x1xf32> to vector<8x32xf32>
    %25 = arith.mulf %24, %22 : vector<8x32xf32>
    %26 = arith.addf %15, %25 : vector<8x32xf32>
    %c1 = arith.constant 1 : index
    %c0_18 = arith.constant 0 : index
    %c0_19 = arith.constant 0 : index
    %27 = vector.load %arg6[%c1, %c0_18, %c0_19] : memref<4x32x32xf32, #tpu.memory_space<vmem>>, vector<1x32x32xf32>
    %28 = vector.shape_cast %27 : vector<1x32x32xf32> to vector<32x32xf32>
    %cst_20 = arith.constant dense<0.000000e+00> : vector<8x32xf32>
    %29 = tpu.matmul %0, %28, %cst_20 {dimension_numbers = #tpu.dot_dimension_numbers<[1], [0], [0], [1], [0, 0, 1, 1], [], []>} : vector<8x32xf32>, vector<32x32xf32>, vector<8x32xf32> -> vector<8x32xf32>
    %c1_21 = arith.constant 1 : index
    %c0_22 = arith.constant 0 : index
    %c0_23 = arith.constant 0 : index
    %30 = vector.load %arg7[%c1_21, %c0_22, %c0_23] : memref<4x1x32xf32, #tpu.memory_space<vmem>>, vector<1x1x32xf32>
    %31 = vector.shape_cast %30 : vector<1x1x32xf32> to vector<1x32xf32>
    %32 = vector.broadcast %31 : vector<1x32xf32> to vector<8x32xf32>
    %33 = arith.addf %29, %32 : vector<8x32xf32>
    %34 = vector.extract_strided_slice %10 {offsets = [0, 1], sizes = [8, 1], strides = [1, 1]} : vector<8x4xf32> to vector<8x1xf32>
    %35 = vector.broadcast %34 : vector<8x1xf32> to vector<8x32xf32>
    %36 = arith.mulf %35, %33 : vector<8x32xf32>
    %37 = arith.addf %26, %36 : vector<8x32xf32>
    %c2 = arith.constant 2 : index
    %c0_24 = arith.constant 0 : index
    %c0_25 = arith.constant 0 : index
    %38 = vector.load %arg6[%c2, %c0_24, %c0_25] : memref<4x32x32xf32, #tpu.memory_space<vmem>>, vector<1x32x32xf32>
    %39 = vector.shape_cast %38 : vector<1x32x32xf32> to vector<32x32xf32>
    %cst_26 = arith.constant dense<0.000000e+00> : vector<8x32xf32>
    %40 = tpu.matmul %0, %39, %cst_26 {dimension_numbers = #tpu.dot_dimension_numbers<[1], [0], [0], [1], [0, 0, 1, 1], [], []>} : vector<8x32xf32>, vector<32x32xf32>, vector<8x32xf32> -> vector<8x32xf32>
    %c2_27 = arith.constant 2 : index
    %c0_28 = arith.constant 0 : index
    %c0_29 = arith.constant 0 : index
    %41 = vector.load %arg7[%c2_27, %c0_28, %c0_29] : memref<4x1x32xf32, #tpu.memory_space<vmem>>, vector<1x1x32xf32>
    %42 = vector.shape_cast %41 : vector<1x1x32xf32> to vector<1x32xf32>
    %43 = vector.broadcast %42 : vector<1x32xf32> to vector<8x32xf32>
    %44 = arith.addf %40, %43 : vector<8x32xf32>
    %45 = vector.extract_strided_slice %10 {offsets = [0, 2], sizes = [8, 1], strides = [1, 1]} : vector<8x4xf32> to vector<8x1xf32>
    %46 = vector.broadcast %45 : vector<8x1xf32> to vector<8x32xf32>
    %47 = arith.mulf %46, %44 : vector<8x32xf32>
    %48 = arith.addf %37, %47 : vector<8x32xf32>
    %c3 = arith.constant 3 : index
    %c0_30 = arith.constant 0 : index
    %c0_31 = arith.constant 0 : index
    %49 = vector.load %arg6[%c3, %c0_30, %c0_31] : memref<4x32x32xf32, #tpu.memory_space<vmem>>, vector<1x32x32xf32>
    %50 = vector.shape_cast %49 : vector<1x32x32xf32> to vector<32x32xf32>
    %cst_32 = arith.constant dense<0.000000e+00> : vector<8x32xf32>
    %51 = tpu.matmul %0, %50, %cst_32 {dimension_numbers = #tpu.dot_dimension_numbers<[1], [0], [0], [1], [0, 0, 1, 1], [], []>} : vector<8x32xf32>, vector<32x32xf32>, vector<8x32xf32> -> vector<8x32xf32>
    %c3_33 = arith.constant 3 : index
    %c0_34 = arith.constant 0 : index
    %c0_35 = arith.constant 0 : index
    %52 = vector.load %arg7[%c3_33, %c0_34, %c0_35] : memref<4x1x32xf32, #tpu.memory_space<vmem>>, vector<1x1x32xf32>
    %53 = vector.shape_cast %52 : vector<1x1x32xf32> to vector<1x32xf32>
    %54 = vector.broadcast %53 : vector<1x32xf32> to vector<8x32xf32>
    %55 = arith.addf %51, %54 : vector<8x32xf32>
    %56 = vector.extract_strided_slice %10 {offsets = [0, 3], sizes = [8, 1], strides = [1, 1]} : vector<8x4xf32> to vector<8x1xf32>
    %57 = vector.broadcast %56 : vector<8x1xf32> to vector<8x32xf32>
    %58 = arith.mulf %57, %55 : vector<8x32xf32>
    %59 = arith.addf %48, %58 : vector<8x32xf32>
    %c0_36 = arith.constant 0 : index
    %c0_37 = arith.constant 0 : index
    %60 = vector.load %arg8[%c0_36, %c0_37] : memref<8x32xf32, #tpu.memory_space<vmem>>, vector<8x32xf32>
    tpu.vector_store %arg8[%c0_36, %c0_37], %59 {strides = array<i32>} : memref<8x32xf32, #tpu.memory_space<vmem>>, vector<8x32xf32>,
    return
  }
  func.func @transform_0(%arg0: i32) -> (i32, i32) {
    %c0_i32 = arith.constant 0 : i32
    %c0_i32_0 = arith.constant 0 : i32
    return %arg0, %c0_i32 : i32, i32
  }
  func.func @transform_1(%arg0: i32) -> (i32, i32) {
    %c0_i32 = arith.constant 0 : i32
    %c0_i32_0 = arith.constant 0 : i32
    %c0_i32_1 = arith.constant 0 : i32
    return %c0_i32, %c0_i32_0 : i32, i32
  }
  func.func @transform_2(%arg0: i32) -> (i32, i32) {
    %c0_i32 = arith.constant 0 : i32
    %c0_i32_0 = arith.constant 0 : i32
    %c0_i32_1 = arith.constant 0 : i32
    return %c0_i32, %c0_i32_0 : i32, i32
  }
  func.func @transform_3(%arg0: i32) -> (i32, i32) {
    %c0_i32 = arith.constant 0 : i32
    %c0_i32_0 = arith.constant 0 : i32
    %c0_i32_1 = arith.constant 0 : i32
    return %c0_i32, %c0_i32_0 : i32, i32
  }
  func.func @transform_4(%arg0: i32) -> (i32, i32) {
    %c0_i32 = arith.constant 0 : i32
    %c0_i32_0 = arith.constant 0 : i32
    %c0_i32_1 = arith.constant 0 : i32
    return %c0_i32, %c0_i32_0 : i32, i32
  }
  func.func @transform_5(%arg0: i32) -> (i32, i32, i32) {
    %c0_i32 = arith.constant 0 : i32
    %c0_i32_0 = arith.constant 0 : i32
    %c0_i32_1 = arith.constant 0 : i32
    %c0_i32_2 = arith.constant 0 : i32
    return %c0_i32, %c0_i32_0, %c0_i32_1 : i32, i32, i32
  }
  func.func @transform_6(%arg0: i32) -> (i32, i32, i32) {
    %c0_i32 = arith.constant 0 : i32
    %c0_i32_0 = arith.constant 0 : i32
    %c0_i32_1 = arith.constant 0 : i32
    %c0_i32_2 = arith.constant 0 : i32
    return %c0_i32, %c0_i32_0, %c0_i32_1 : i32, i32, i32
  }
  func.func @transform_7(%arg0: i32) -> (i32, i32) {
    %c0_i32 = arith.constant 0 : i32
    %c0_i32_0 = arith.constant 0 : i32
    return %arg0, %c0_i32 : i32, i32
  }
}

</mosaic_0001>

<bundles_post_ra>
// kernel: tpu_custom_call.1
= control target key start
LH: loop header
LB: loop body
LE: loop exit
PB: predicated region body
PF: predicated region fallthrough
CT: control target
= control target key end

     0   :  { %12 = vsyncpa [#allocation3], 0  ;;  %s1627_s0 = inlined_call_operand.hbm [shape: f32[16,32], index: 0, kind: input, shape index: {}]   ;;  %s1628_s1 = inlined_call_operand.vmem [shape: f32[32,4], index: 1, kind: input, shape index: {}]   ;;  %s1629_s2 = inlined_call_operand.vmem [shape: f32[1,4], index: 2, kind: input, shape index: {}]   ;;  %s1630_s3 = inlined_call_operand.vmem [shape: f32[32,32], index: 3, kind: input, shape index: {}]   ;;  %s1631_s4 = inlined_call_operand.vmem [shape: f32[1,32], index: 4, kind: input, shape index: {}]   ;;  %s1632_s5 = inlined_call_operand.hbm [shape: f32[4,32,32], index: 5, kind: input, shape index: {}]   ;;  %s1633_s6 = inlined_call_operand.vmem [shape: f32[4,1,32], index: 6, kind: input, shape index: {}]   ;;  %s1634_s7 = inlined_call_operand.hbm [shape: f32[16,32], index: 7, kind: output, shape index: {}]  }
   0x1   :  { %14 = vsyncpa [#allocation3 + $0x1], 0 }
   0x2   :  { %15 = vsyncpa [#allocation6], 0 }
   0x3   :  { %16 = vsyncpa [#allocation4], 0 }
   0x4   :  { %18 = vsyncpa [#allocation4 + $0x1], 0  ;;  %s1351_s24 = smov 0   ;;  %s1353_s25 = smov 0  }
   0x5   :  { %s1355_s26 = smov 0   ;;  %s1357_s27 = smov 0  }
   0x6 LB: > { %s1372_s28 = sadd.s32 4294967295, %s1297_s27   ;;  %s932_s29 = sadd.s32 4294967294, %s1297_s27   ;;  %s1297_s27 = sphi %s1357_s27, %s1654_s27   ;;  %s1293_s26 = sphi %s1355_s26, %s1653_s26   ;;  %s1289_s25 = sphi %s1353_s25, %s1652_s25   ;;  %s1285_s24 = sphi %s1351_s24, %s1651_s24  }
   0x7   : > { %p44_p0 = scmp.ne.s32.totalorder %s1289_s25, %s1285_s24  ;;  %p1635_p1 = scmp.eq.s32.totalorder %s1372_s28, 0 }
   0x8   : > { %p200_p3 = scmp.eq.s32.totalorder %s932_s29, 1  ;;  %p933_p5 = scmp.ge.s32.totalorder %s1297_s27, 1 }
   0x9   : > { %p1381_p4 = por %p1635_p1, %p44_p0  ;;  %p207_p7 = scmp.lt.s32.totalorder %s1297_s27, 3 }
   0xa   : > { %p1386_p6 = por %p200_p3, %p44_p0  ;;  %s1299_s10 = smov [#allocation5]  }
   0xb   : > { %s1638_s30 = scalar_select %p1381_p4, 1, 0 }
   0xc   : > { %s1639_s8 = scalar_select %p1386_p6, 1, 0 }
   0xd   : > { %p1391_p8 = pnand %p933_p5, %p207_p7  ;;  %s231_s11 = sshll.u32 %s1299_s10, 4  ;;  %s1395_s11 = int_to_ptr.vmem [resolvable:$true] %s231_s11 }
   0xe   : > { %s1407_s13 = sadd.s32 1, %s1297_s27   ;;  %s31_s14 = sadd.s32 1, %s1293_s26 }
   0xf   : > { %s1640_s9 = scalar_select %p1391_p8, 1, 0 }
  0x10   : > { %p1102_p9 = pneg %p1391_p8  ;;  %s28_s15 = ssub.s32 %s1297_s27, %s1407_s13 }
  0x11   : > { %s1169_s18 = scalar_lea.hbm %s1632_s5, 2048 }
  0x12   : > { %p1402_p11 = pnand %p1102_p9, %p1635_p1  ;;  %p1170_p12 = scmp.ne.s32.totalorder %s1632_s5, %s1169_s18 }
  0x13   : > { %p1176_p5 = scmp.lt.u32.totalorder %s1169_s18, %s1632_s5 }
  0x14   : > { %p1171_p13 = pneg %p1402_p11 }
  0x16   : > { %p1172_p0 = pnand %p1171_p13, %p1170_p12 }
  0x18   : > { %p1173_p3 = pneg %p1172_p0 }
  0x1a   : > { %p1178_p7 = pnand %p1176_p5, %p1173_p3 }
  0x1c   : > { %1181 = shalt.err (!%p1178_p7)
}
  0x1d   : > { %s1182_s23 = scalar_lea.vmem %s1395_s11, 2048  ;;  %p1190_p2 = scmp.lt.s32.totalorder %s1395_s11, %s1395_s11 }
  0x1e   : > { %p1183_p9 = scmp.ne.s32.totalorder %s1395_s11, %s1182_s23  ;;  %p1191_p6 = scmp.lt.s32.totalorder %s1182_s23, %s1182_s23 }
  0x20   : > { %p1185_p10 = pnand %p1183_p9, %p1171_p13  ;;  %p1192_p4 = por %p1191_p6, %p1190_p2 }
  0x22   : > { %p1186_p1 = pneg %p1185_p10 }
  0x24   : > { %p1193_p8 = pnand %p1192_p4, %p1186_p1 }
  0x26   : > { %1196 = shalt.err (!%p1193_p8)
}
  0x27   : > { %s1300_s29 = smov 128   ;;  %s1301_s10 = smov 8  }
  0x28   : > { %1105 = dma.hbm_to_vmem [thread:$0]  (!%p1402_p11), %s1632_s5, 2048, %s1395_s11, [#allocation6], %s1300_s29, %s1300_s29, %s1301_s10  }
  0x29   : > { %p29_p2 = scmp.eq.s32.totalorder %s28_s15, 0  ;;  %p38_p1 = scmp.ne.s32.totalorder %s1293_s26, %s1289_s25 }
  0x2a   : > { %p39_p4 = scmp.eq.s32.totalorder %s1297_s27, 0  ;;  %p1115_p6 = scmp.lt.s32.totalorder %s1297_s27, 2 }
  0x2b   : > { %s1438_s18 = scalar_select %p29_p2, %s1293_s26, %s31_s14  }
  0x2c   : > { %p40_p8 = por %p39_p4, %p38_p1  ;;  %p1642_p10 = scmp.eq.s32.totalorder %s1372_s28, 1 }
  0x2d   : > { %s248_s20 = sand.u32 1, %s1293_s26   ;;  %s937_s21 = sshll.u32 %s1297_s27, 7 }
  0x2e   : > { %p1442_p12 = por %p1642_p10, %p38_p1  ;;  %s936_s22 = sshll.u32 %s248_s20, 3 }
  0x2f   : > { %s1451_s16 = scalar_lea.hbm %s1627_s0, %s937_s21  ;;  %s252_s11 = scalar_lea.vmem [#allocation2], %s936_s22 }
  0x30   : > { %s259_s14 = sshll.u32 %s252_s11, 4  ;;  %p1453_p11 = pnand %p1115_p6, %p40_p8  ;;  %s1457_s14 = int_to_ptr.vmem [resolvable:$true] %s259_s14 }
  0x31   : > { %s249_s29 = scalar_lea.sflag [#allocation3], %s248_s20  ;;  %s1197_s10 = scalar_lea.hbm %s1451_s16, 128 }
  0x32   : > { %p1198_p13 = scmp.ne.s32.totalorder %s1451_s16, %s1197_s10  ;;  %p1199_p0 = pneg %p1453_p11 }
  0x33   : > { %s1202_s22 = scalar_lea.hbm %s1627_s0, 256  ;;  %p1203_p7 = scmp.lt.u32.totalorder %s1451_s16, %s1627_s0 }
  0x34   : > { %p1200_p3 = pnand %p1199_p0, %p1198_p13  ;;  %p1204_p9 = scmp.lt.u32.totalorder %s1202_s22, %s1197_s10 }
  0x35   : > { %p1206_p1 = scmp.lt.u32.totalorder %s1197_s10, %s1451_s16 }
  0x36   : > { %p1201_p5 = pneg %p1200_p3  ;;  %p1205_p2 = por %p1204_p9, %p1203_p7 }
  0x38   : > { %p1207_p4 = por %p1206_p1, %p1205_p2 }
  0x3a   : > { %p1208_p6 = pnand %p1207_p4, %p1201_p5 }
  0x3c   : > { %1211 = shalt.err (!%p1208_p6)
}
  0x3d   : > { %s1212_s20 = scalar_lea.vmem %s1457_s14, 128  ;;  %s1302_s11 = smov [#allocation2]  }
  0x3e   : > { %p1213_p8 = scmp.ne.s32.totalorder %s1457_s14, %s1212_s20  ;;  %s1217_s17 = sshll.u32 %s1302_s11, 4  ;;  %s1218_s17 = int_to_ptr.vmem [resolvable:$false] %s1217_s17 }
  0x3f   : > { %s1219_s21 = scalar_lea.vmem %s1218_s17, 256  ;;  %p1220_p3 = scmp.lt.s32.totalorder %s1457_s14, %s1218_s17 }
  0x40   : > { %p1215_p10 = pnand %p1213_p8, %p1199_p0  ;;  %p1221_p7 = scmp.lt.s32.totalorder %s1219_s21, %s1212_s20 }
  0x42   : > { %p1216_p13 = pneg %p1215_p10  ;;  %p1222_p9 = por %p1221_p7, %p1220_p3 }
  0x44   : > { %p1223_p2 = pnand %p1222_p9, %p1216_p13 }
  0x46   : > { %1226 = shalt.err (!%p1223_p2)
}
  0x47   : > { %1109 = dma.hbm_to_vmem [thread:$0]  (!%p1453_p11), %s1451_s16, 128, %s1457_s14, %s249_s29  }
  0x48   : > { %p1645_p5 = scmp.ne.s32.totalorder %s1640_s9, 0 }
  0x49   : > { %s1487_s10 = sand.u32 (!%p1645_p5), 1, %s1289_s25   ;;  %p1646_p0 = scmp.ne.s32.totalorder (!%p1645_p5), %s1638_s30, 0 }
  0x4a   : > { %268 = sbr.rel (%p1645_p5) target bundleno = 490 (0x1ea), region = 48  ;;  %s939_s22 = sshll.u32 (!%p1645_p5), %s1487_s10, 3 }
  0x4b   : > { %s271_s12 = scalar_lea.sflag (!%p1645_p5), [#allocation3], %s1487_s10  ;;  %s1493_s23 = scalar_lea.vmem (!%p1645_p5), [#allocation2], %s939_s22 }
  0x51   : > { %1272 = dma.done.wait (%p1646_p0), %s271_s12, 128  }
  0x52   : > { %1274 = vsyncadd (%p1646_p0), %s271_s12, 4294967168  ;;  %p1647_p11 = scmp.eq.s32.totalorder %s1372_s28, 0 }
  0x54   : > { %1276 = dma.done.wait (%p1647_p11), [#allocation6], 2048   ;;  %p1648_p1 = pmov %p1647_p11 }
  0x55   : > { %v1303_v0 = vmov 0.0|0.0   ;;  %vm1304_vm0 = vmmov 0   ;;  %v1305_v1 = vmov 0.0   ;;  %v310_v2 = vld [vmem:[%s1628_s1] sm:$0xff]  ;;  %v311_v3 = vld [vmem:[%s1628_s1 + $0x8] sm:$0xff]  ;;  %v312_v4 = vld [vmem:[%s1628_s1 + $0x10] sm:$0xff] }
  0x56   : > { %1278 = vsyncadd (%p1648_p1), [#allocation6], 4294965248  ;;  %1058 = vmatprep.subr.bf16.mxu0 %v1303_v0  ;;  %1000 = vmatprep.mubr.msk.f32.mxu0 %vm1304_vm0, %v1305_v1  ;;  %v1059_v5 = vpack.c.bf16 %v311_v3, %v310_v2  ;;  %v313_v6 = vld [vmem:[%s1628_s1 + $0x18] sm:$0xff]  ;;  %v401_v7 = vld [vmem:[%s1630_s3] sm:$0xff]  ;;  %vm321_vm1 = vcmask 261120   ;;  %v1306_v39 = vmov 2  }
  0x57   : > { %1064 = vmatprep.subr.bf16.mxu1 %v1303_v0  ;;  %1011 = vmatprep.mubr.msk.f32.mxu1 %vm1304_vm0, %v1305_v1  ;;  %v402_v8 = vld [vmem:[%s1630_s3 + $0x8] sm:$0xff]  ;;  %v1062_v9 = vpack.c.bf16 %v313_v6, %v312_v4  ;;  %v403_v11 = vld [vmem:[%s1630_s3 + $0x10] sm:$0xff]  ;;  %v404_v12 = vld [vmem:[%s1630_s3 + $0x18] sm:$0xff]  ;;  %v1307_v40 = vmov 0   ;;  %v1308_v59 = vmov 3   ;;  %v1309_v60 = vmov 1  }
  0x58   : > { %1060 = vmatpush3.bf16.msra.mxu0 %v1059_v5  ;;  %v1065_v10 = vpack.c.bf16 %v402_v8, %v401_v7  ;;  %v482_v13 = vld [vmem:[#allocation5] sm:$0xff]  ;;  %v483_v14 = vld [vmem:[#allocation5 + $0x8] sm:$0xff]  ;;  %v1068_v15 = vpack.c.bf16 %v404_v12, %v403_v11  ;;  %v309_v18 = vld [vmem:[%s1493_s23] sm:$0xff]  ;;  %1162 = vset.pattern.permute.xlu1 %v1306_v39  ;;  %s959_s23 = sshll.u32 %s1372_s28, 7  ;;  %s308_s29 = scalar_lea.vmem [#allocation7], %s939_s22 }
  0x59   : > { %1061 = vmatprep.subr.bf16.mxu0 %v1303_v0  ;;  %v571_v16 = vld [vmem:[#allocation5 + $0x20] sm:$0xff]  ;;  %v572_v17 = vld [vmem:[#allocation5 + $0x28] sm:$0xff]  ;;  %v1071_v19 = vpack.c.bf16 %v483_v14, %v482_v13  ;;  %v484_v20 = vld [vmem:[#allocation5 + $0x10] sm:$0xff]  ;;  %1160 = vset.pattern.permute.xlu0 %v1307_v40  ;;  %s852_s20 = sshll.u32 %s308_s29, 4  ;;  %s1582_s21 = scalar_lea.hbm %s1634_s7, %s959_s23  ;;  %s1584_s20 = int_to_ptr.vmem [resolvable:$true] %s852_s20 }
  0x5a   : > { %1066 = vmatpush3.bf16.msra.mxu1 %v1065_v10  ;;  %v485_v21 = vld [vmem:[#allocation5 + $0x18] sm:$0xff]  ;;  %v1077_v22 = vpack.c.bf16 %v572_v17, %v571_v16  ;;  %v573_v23 = vld [vmem:[#allocation5 + $0x30] sm:$0xff]  ;;  %v660_v26 = vld [vmem:[#allocation5 + $0x40] sm:$0xff]  ;;  %s839_s12 = scalar_lea.sflag [#allocation4], %s1487_s10  ;;  %s1227_s28 = scalar_lea.vmem %s1584_s20, 128 }
  0x5b   : > { %1067 = vmatprep.subr.bf16.mxu1 %v1303_v0  ;;  %v574_v24 = vld [vmem:[#allocation5 + $0x38] sm:$0xff]  ;;  %v1074_v25 = vpack.c.bf16 %v485_v21, %v484_v20  ;;  %v661_v27 = vld [vmem:[#allocation5 + $0x48] sm:$0xff]  ;;  %v749_v29 = vld [vmem:[#allocation5 + $0x60] sm:$0xff]  ;;  %p1228_p4 = scmp.ne.s32.totalorder %s1584_s20, %s1227_s28  ;;  %s1310_s22 = smov [#allocation7]  }
  0x5c   : > { %1063 = vmatpush3.bf16.msra.mxu0 %v1062_v9  ;;  %v1080_v28 = vpack.c.bf16 %v574_v24, %v573_v23  ;;  %v750_v30 = vld [vmem:[#allocation5 + $0x68] sm:$0xff]  ;;  %v1083_v31 = vpack.c.bf16 %v661_v27, %v660_v26  ;;  %v662_v32 = vld [vmem:[#allocation5 + $0x50] sm:$0xff]  ;;  %v663_v33 = vld [vmem:[#allocation5 + $0x58] sm:$0xff]  ;;  %s1231_s30 = sshll.u32 %s1310_s22, 4  ;;  %s1232_s30 = int_to_ptr.vmem [resolvable:$false] %s1231_s30 }
  0x5d   : > { %1070 = vmatprep.subr.bf16.mxu0 %v1303_v0  ;;  %v1089_v34 = vpack.c.bf16 %v750_v30, %v749_v29  ;;  %v751_v35 = vld [vmem:[#allocation5 + $0x70] sm:$0xff]  ;;  %v752_v36 = vld [vmem:[#allocation5 + $0x78] sm:$0xff]  ;;  %v1086_v37 = vpack.c.bf16 %v663_v33, %v662_v32  ;;  %p1229_p6 = pnand %p1228_p4, %p1442_p12  ;;  %s1233_s9 = scalar_lea.vmem %s1232_s30, 256 }
  0x5e   : > { %1069 = vmatpush3.bf16.msra.mxu1 %v1068_v15  ;;  %v1092_v38 = vpack.c.bf16 %v752_v36, %v751_v35  ;;  %v942_v41 = vld [vmem:[%s1629_s2] ss:$0 sm:$0xff]  ;;  %v953_v2 = vld [vmem:[%s1633_s6 + $0x2] ss:$0 sm:$0xff]  ;;  %v950_v3 = vld [vmem:[%s1633_s6 + $0x1] ss:$0 sm:$0xff]  ;;  %p1234_p10 = scmp.lt.s32.totalorder %s1584_s20, %s1232_s30  ;;  %p1235_p13 = scmp.lt.s32.totalorder %s1233_s9, %s1227_s28 }
  0x5f   : > { %1001 = vmatmul.mubr.msk.f32.vlgmr.msra.gmra.mrb[0].mxu0 %vm321_vm1, %v309_v18  ;;  %1076 = vmatprep.subr.bf16.mxu1 %v1303_v0  ;;  %v947_v61 = vld [vmem:[%s1633_s6] ss:$0 sm:$0xff]  ;;  %v956_v7 = vld [vmem:[%s1633_s6 + $0x3] ss:$0 sm:$0xff]  ;;  %p1230_p8 = pneg %p1229_p6 }
  0x60   : > { %1072 = vmatpush3.bf16.msra.mxu0 %v1071_v19  ;;  %1022 = vmatprep.mubr.msk.f32.mxu0 %vm1304_vm0, %v1305_v1  ;;  %v945_v63 = vld [vmem:[%s1631_s4] ss:$0 sm:$0xff]  ;;  %p1236_p3 = por %p1235_p13, %p1234_p10 }
  0x61   : > { %1073 = vmatprep.subr.bf16.mxu0 %v1303_v0  ;;  %1012 = vmatmul.mubr.msk.f32.vlgmr.msra.gmra.mrb[0].mxu1 %vm321_vm1, %v309_v18 }
  0x62   : > { %1078 = vmatpush3.bf16.msra.mxu1 %v1077_v22  ;;  %1033 = vmatprep.mubr.msk.f32.mxu1 %vm1304_vm0, %v1305_v1  ;;  %p1237_p7 = pnand %p1236_p3, %p1230_p8 }
  0x63   : > { %1079 = vmatprep.subr.bf16.mxu1 %v1303_v0 }
  0x64   : > { %1075 = vmatpush3.bf16.msra.mxu0 %v1074_v25 }
  0x65   : > { %1082 = vmatprep.subr.bf16.mxu0 %v1303_v0 }
  0x66   : > { %1081 = vmatpush3.bf16.msra.mxu1 %v1080_v28 }
  0x67   : > { %1023 = vmatmul.mubr.msk.f32.vlgmr.msra.gmra.mrb[2].mxu0 %vm321_vm1, %v309_v18  ;;  %1088 = vmatprep.subr.bf16.mxu1 %v1303_v0 }
  0x68   : > { %1084 = vmatpush3.bf16.msra.mxu0 %v1083_v31  ;;  %1044 = vmatprep.mubr.msk.f32.mxu0 %vm1304_vm0, %v1305_v1 }
  0x69   : > { %1085 = vmatprep.subr.bf16.mxu0 %v1303_v0  ;;  %1034 = vmatmul.mubr.msk.f32.vlgmr.msra.gmra.mrb[2].mxu1 %vm321_vm1, %v309_v18 }
  0x6a   : > { %1090 = vmatpush3.bf16.msra.mxu1 %v1089_v34  ;;  %1055 = vmatprep.mubr.msk.f32.mxu1 %vm1304_vm0, %v1305_v1 }
  0x6b   : > { %1091 = vmatprep.subr.bf16.mxu1 %v1303_v0 }
  0x6c   : > { %1087 = vmatpush3.bf16.msra.mxu0 %v1086_v37 }
  0x6e   : > { %1093 = vmatpush3.bf16.msra.mxu1 %v1092_v38 }
  0x6f   : > { %1045 = vmatmul.mubr.msk.f32.vlgmr.msra.gmra.mrb[4].mxu0 %vm321_vm1, %v309_v18 }
  0x71   : > { %1056 = vmatmul.mubr.msk.f32.vlgmr.msra.gmra.mrb[4].mxu1 %vm321_vm1, %v309_v18 }
 0x132   : > { %v391_v42 = vpop.f32.mrb[0].mxu0 }
 0x133   : > { %v392_v43 = vadd.f32 %v942_v41, %v391_v42  ;;  %v1002_v44 = vpop.f32.mrb[1].mxu0 }
 0x134   : > { %v478_v45 = vpop.f32.mrb[0].mxu1 }
 0x135   : > { %v944_v46 = vmul.f32 -1.442695, %v392_v43  ;;  %v1013_v47 = vpop.f32.mrb[1].mxu1  ;;  %v479_v1 = vadd.f32 %v945_v63, %v478_v45 }
 0x137   : > { %1165 = vpow2.f32 %v944_v46 }
 0x13a   : > { %v559_v48 = vpop.f32.mrb[2].mxu0 }
 0x13b   : > { %v1024_v49 = vpop.f32.mrb[3].mxu0  ;;  %v560_v62 = vadd.f32 %v947_v61, %v559_v48 }
 0x13c   : > { %v649_v50 = vpop.f32.mrb[2].mxu1 }
 0x13d   : > { %v1035_v51 = vpop.f32.mrb[3].mxu1  ;;  %v650_v9 = vadd.f32 %v950_v3, %v649_v50 }
 0x141   : > { %v1166_v52 = vpop.eup %1165 }
 0x142   : > { %v398_v53 = vadd.f32 1.0, %v1166_v52  ;;  %v738_v54 = vpop.f32.mrb[4].mxu0 }
 0x143   : > { %v1046_v55 = vpop.f32.mrb[5].mxu0  ;;  %v739_v8 = vadd.f32 %v953_v2, %v738_v54 }
 0x144   : > { %1167 = vrcp.f32 %v398_v53  ;;  %v827_v57 = vpop.f32.mrb[4].mxu1 }
 0x145   : > { %v1057_v58 = vpop.f32.mrb[5].mxu1  ;;  %v828_v11 = vadd.f32 %v956_v7, %v827_v57 }
 0x14e   : > { %v1168_v56 = vpop.eup %1167 }
 0x14f   : > { %743 = vperm.xlu1 %1162, %v1168_v56   ;;  %565 = vperm.xlu0 %1160, %v1168_v56  }
 0x153   : > { %1163 = vset.pattern.permute.xlu1 %v1308_v59  ;;  %1161 = vset.pattern.permute.xlu0 %v1309_v60 }
 0x154   : > { %832 = vperm.xlu1 %1163, %v1168_v56   ;;  %654 = vperm.xlu0 %1161, %v1168_v56  }
 0x158   : > { %1164 = vset.pattern.permute.xlu0 %v1308_v59 }
 0x1ce   : > { %v566_v0 = vpop.permute.xlu0 %565  ;;  %v744_v4 = vpop.permute.xlu1 %743 }
 0x1cf   : > { %v568_v5 = vmul.f32 %v566_v0, %v560_v62  ;;  %v746_v14 = vmul.f32 %v744_v4, %v739_v8 }
 0x1d1   : > { %v569_v6 = vadd.f32 %v568_v5, %v479_v1 }
 0x1d3   : > { %v655_v10 = vpop.permute.xlu0 %654  ;;  %v833_v13 = vpop.permute.xlu1 %832 }
 0x1d4   : > { %v657_v12 = vmul.f32 %v655_v10, %v650_v9  ;;  %v835_v16 = vmul.f32 %v833_v13, %v828_v11 }
 0x1d6   : > { %v658_v15 = vadd.f32 %v657_v12, %v569_v6 }
 0x1d8   : > { %v747_v17 = vadd.f32 %v746_v14, %v658_v15 }
 0x1da   : > { %v836_v18 = vadd.f32 %v835_v16, %v747_v17 }
 0x1dc   : > { %837 = vst.msk [vmem:[%s308_s29] sm:$0xff] %vm321_vm1, %v836_v18 }
 0x1dd   : > { %1240 = shalt.err (!%p1237_p7)
}
 0x1de   : > { %s1241_s10 = scalar_lea.hbm %s1582_s21, 128  ;;  %s1245_s15 = scalar_lea.hbm %s1634_s7, 256 }
 0x1df   : > { %p1242_p9 = scmp.ne.s32.totalorder %s1582_s21, %s1241_s10  ;;  %p1246_p0 = scmp.lt.u32.totalorder %s1582_s21, %s1634_s7 }
 0x1e0   : > { %p1247_p11 = scmp.lt.u32.totalorder %s1245_s15, %s1241_s10  ;;  %p1249_p4 = scmp.lt.u32.totalorder %s1241_s10, %s1582_s21 }
 0x1e1   : > { %p1243_p2 = pnand %p1242_p9, %p1442_p12 }
 0x1e2   : > { %p1248_p1 = por %p1247_p11, %p1246_p0 }
 0x1e3   : > { %p1244_p5 = pneg %p1243_p2 }
 0x1e4   : > { %p1250_p6 = por %p1249_p4, %p1248_p1 }
 0x1e6   : > { %p1251_p8 = pnand %p1250_p6, %p1244_p5 }
 0x1e8   : > { %1254 = shalt.err (!%p1251_p8)
}
 0x1e9   : > { %1100 = dma.vmem_to_hbm [thread:$0]  (%p1442_p12), %s1584_s20, 128, %s1582_s21, %s839_s12  }
 0x1ea PF: > { %s864_s11 = sand.u32 1, %s1285_s24   ;;  %p1649_p10 = scmp.ne.s32.totalorder %s1639_s8, 0 }
 0x1eb   : > { %p1650_p13 = scmp.ge.s32.totalorder %s1297_s27, 2  ;;  %s865_s17 = scalar_lea.sflag [#allocation4], %s864_s11 }
 0x1ed   : > { %p1111_p3 = pnand %p1650_p13, %p1649_p10 }
 0x1ef   : > { %1280 = dma.done.wait (!%p1111_p3), %s865_s17, 128  }
 0x1f0   : > { %1282 = vsyncadd (!%p1111_p3), %s865_s17, 4294967168  ;;  %p21_p7 = scmp.ge.s32.totalorder %s1407_s13, 4   ;;  %s1651_s24 = smov %s1289_s25 }
 0x1f1   : > { %s1652_s25 = smov %s1293_s26  ;;  %s1653_s26 = smov %s1438_s18 }
 0x1f2   : > { %s1654_s27 = smov %s1407_s13  ;;  %23 = sbr.rel (!%p21_p7) target bundleno = 6 (0x6), region = 103 }
 0x1f9   :  { %870 = vsyncpa [#allocation3], 1 }
 0x1fa   :  { %872 = vsyncpa [#allocation3 + $0x1], 1 }
 0x1fb   :  { %873 = vsyncpa [#allocation6], 1 }
 0x1fc   :  { %874 = vsyncpa [#allocation4], 1 }
 0x1fd   :  { %876 = vsyncpa [#allocation4 + $0x1], 1 }

</bundles_post_ra>
